<compile_context>
chip_gen: v7x
topology: tpu7x:2x2x1
jax: 0.10.0
libtpu: 0.0.40
codegen_flags: <defaults>
</compile_context>

<pallas_src>
import functools

import numpy as np
import jax
import jax.numpy as jnp
from jax.experimental import pallas as pl
from jax.experimental.pallas import tpu as pltpu

B, L, D = 2, 8, 32          # batch, sequence length, feature/class dim
N_TIMESTEP = 100


# ----------------------------------------------------------------------------
# Noise schedule (numpy glue, mirrors set_new_noise_schedule / 'linear')
# ----------------------------------------------------------------------------
def build_sqrt_alphas_cumprod_prev(n_timestep, linear_start=1e-4, linear_end=2e-2):
    betas = np.linspace(linear_start, linear_end, n_timestep, dtype=np.float64)
    alphas = 1.0 - betas
    alphas_cumprod = np.cumprod(alphas, axis=0)
    return np.sqrt(np.append(1.0, alphas_cumprod))  # shape (n_timestep + 1,)


# ----------------------------------------------------------------------------
# Single fused kernel: q_sample + (implicit concat) + denoise + L1(sum)
#                      + log_softmax (+ transpose folded into output stores)
# ----------------------------------------------------------------------------
def _fused_p_losses_kernel(c_ref, sr_ref, x0_ref, noise_ref, w_ref, bias_ref,
                           loss_ref, xrecon_ref, logp_ref):
    x0 = x0_ref[...]                                 # (B, L, D) f32
    c = c_ref[...]                                   # (B, 1, 1) sqrt(alpha_cumprod)
    sigma = jnp.sqrt((1.0 - c) * (1.0 + c))          # == sqrt(1 - c^2), no cancellation

    # q_sample + conditional concat collapsed: denoiser input per batch row is
    #   cat[:, :L] + cat[:, L:] + noise_level = sr + (c*x0 + sigma*noise) + c
    # Fully vectorized VPU broadcast of the (B,1,1) per-batch scalars.
    h = sr_ref[...] + c * x0 + sigma * noise_ref[...] + c    # (B, L, D)

    # Layout-preserving collapse to (B*L, D) (identical f32 (8,128) tiles),
    # then a single batched MXU matmul instead of B tiny dots.
    h2 = h.reshape(B * L, D)
    y = jnp.dot(h2, w_ref[...], preferred_element_type=jnp.float32) + bias_ref[...]
    x_recon = jnp.tanh(y)                            # (B*L, D)

    xrecon_ref[...] = x_recon.reshape(B, L, D)

    # L1 loss with reduction='sum' — one full-block reduce, written once to SMEM.
    loss_ref[0, 0] = jnp.sum(jnp.abs(x0.reshape(B * L, D) - x_recon))

    # log_softmax over the class dim (input to nn.CTCLoss).
    m = jnp.max(x_recon, axis=-1, keepdims=True)
    lse = jnp.log(jnp.sum(jnp.exp(x_recon - m), axis=-1, keepdims=True)) + m
    logp = (x_recon - lse).reshape(B, L, D)

    # Fold the (B, L, D) -> (L, B, D) transpose into the output stores
    # (static per-batch column writes; no separate XLA transpose pass).
    for b in range(B):
        logp_ref[:, b, :] = logp[b]


_fused_p_losses = pl.pallas_call(
    _fused_p_losses_kernel,
    out_shape=(
        jax.ShapeDtypeStruct((1, 1), jnp.float32),      # L1-sum loss (SMEM scalar)
        jax.ShapeDtypeStruct((B, L, D), jnp.float32),   # x_recon
        jax.ShapeDtypeStruct((L, B, D), jnp.float32),   # log_probs (CTC input layout)
    ),
    in_specs=[
        pl.BlockSpec(memory_space=pltpu.MemorySpace.VMEM),   # c        (B, 1, 1)
        pl.BlockSpec(memory_space=pltpu.MemorySpace.VMEM),   # SR       (B, L, D)
        pl.BlockSpec(memory_space=pltpu.MemorySpace.VMEM),   # HR / x0  (B, L, D)
        pl.BlockSpec(memory_space=pltpu.MemorySpace.VMEM),   # noise    (B, L, D)
        pl.BlockSpec(memory_space=pltpu.MemorySpace.VMEM),   # W        (D, D)
        pl.BlockSpec(memory_space=pltpu.MemorySpace.VMEM),   # bias     (1, D)
    ],
    out_specs=(
        pl.BlockSpec(memory_space=pltpu.MemorySpace.SMEM),
        pl.BlockSpec(memory_space=pltpu.MemorySpace.VMEM),
        pl.BlockSpec(memory_space=pltpu.MemorySpace.VMEM),
    ),
)


# ----------------------------------------------------------------------------
# p_losses (fully on-device, jittable; no host round trip for the timestep)
# ----------------------------------------------------------------------------
def _p_losses_impl(sacp, w, bias, hr, sr, key, *, num_timesteps):
    k_t, k_c, k_n = jax.random.split(key, 3)
    # t ~ randint(1, num_timesteps + 1), kept on device (no int()/float() sync).
    t = jax.random.randint(k_t, (), 1, num_timesteps + 1)
    lo = sacp[t - 1]
    hi = sacp[t]
    u = jax.random.uniform(k_c, (hr.shape[0],), dtype=jnp.float32)
    continuous_sqrt_alpha_cumprod = (lo + u * (hi - lo)).astype(jnp.float32)   # (B,)
    noise = jax.random.normal(k_n, hr.shape, dtype=jnp.float32)

    loss2d, x_recon, log_probs = _fused_p_losses(
        continuous_sqrt_alpha_cumprod.reshape(hr.shape[0], 1, 1),
        sr, hr, noise, w, bias)
    loss = loss2d[0, 0]

    # TODO(synk): nn.CTCLoss (variable-length dynamic-programming alignment over
    # weighted_mask / predicted_length / text_len) has no clean Pallas equivalent;
    # only its log_softmax input (log_probs, (L, B, D)) is produced here.
    loss_ctc = None
    return loss, loss_ctc, x_recon, log_probs


class GaussianDiffusionPallas:
    def __init__(self, key, n_timestep=N_TIMESTEP):
        self.num_timesteps = n_timestep
        self.sqrt_alphas_cumprod_prev = jnp.asarray(
            build_sqrt_alphas_cumprod_prev(n_timestep), dtype=jnp.float32)
        # deterministic synthetic denoiser parameters
        self.w = (0.1 * jax.random.normal(key, (D, D))).astype(jnp.float32)
        self.bias = jnp.zeros((1, D), dtype=jnp.float32)
        self._forward = jax.jit(
            functools.partial(_p_losses_impl, num_timesteps=self.num_timesteps))

    def p_losses(self, x_in, key):
        return self._forward(self.sqrt_alphas_cumprod_prev, self.w, self.bias,
                             x_in["HR"], x_in["SR"], key)

    def __call__(self, x_in, key):
        return self.p_losses(x_in, key)


if __name__ == "__main__":
    key = jax.random.PRNGKey(0)
    k_model, k_hr, k_sr, k_fwd = jax.random.split(key, 4)

    model = GaussianDiffusionPallas(k_model)

    x_in = {
        "HR": jax.random.normal(k_hr, (B, L, D), dtype=jnp.float32),
        "SR": jax.random.normal(k_sr, (B, L, D), dtype=jnp.float32),
    }

    loss, loss_ctc, x_recon, log_probs = model(x_in, k_fwd)
    jax.block_until_ready((loss, x_recon, log_probs))

    # ---- pure-JAX reference (identical RNG stream) for a sanity check ----
    k_t, k_c, k_n = jax.random.split(k_fwd, 3)
    t = jax.random.randint(k_t, (), 1, model.num_timesteps + 1)
    sacp = model.sqrt_alphas_cumprod_prev
    lo, hi = sacp[t - 1], sacp[t]
    u = jax.random.uniform(k_c, (B,), dtype=jnp.float32)
    c = (lo + u * (hi - lo)).astype(jnp.float32)[:, None, None]
    noise = jax.random.normal(k_n, (B, L, D), dtype=jnp.float32)
    x_noisy = c * x_in["HR"] + jnp.sqrt((1.0 - c) * (1.0 + c)) * noise
    h_ref = x_in["SR"] + x_noisy + c
    x_recon_ref = jnp.tanh(
        jnp.einsum("bld,de->ble", h_ref, model.w, precision="highest") + model.bias)
    loss_ref = jnp.sum(jnp.abs(x_in["HR"] - x_recon_ref))
    logp_ref = jnp.transpose(jax.nn.log_softmax(x_recon_ref, axis=-1), (1, 0, 2))

    assert x_recon.shape == (B, L, D)
    assert log_probs.shape == (L, B, D)
    assert np.isfinite(float(loss))
    np.testing.assert_allclose(np.asarray(x_recon), np.asarray(x_recon_ref),
                               rtol=2e-2, atol=2e-2)
    np.testing.assert_allclose(np.asarray(log_probs), np.asarray(logp_ref),
                               rtol=2e-2, atol=2e-2)
    np.testing.assert_allclose(float(loss), float(loss_ref), rtol=2e-2, atol=5e-2)
    print("KERNEL_OK")
</pallas_src>

<mosaic_0001>
module attributes {stable_mosaic.version = 11 : i64} {
  func.func @_fused_p_losses_kernel(%arg0: memref<2x1x1xf32, #tpu.memory_space<vmem>>, %arg1: memref<2x8x32xf32, #tpu.memory_space<vmem>>, %arg2: memref<2x8x32xf32, #tpu.memory_space<vmem>>, %arg3: memref<2x8x32xf32, #tpu.memory_space<vmem>>, %arg4: memref<32x32xf32, #tpu.memory_space<vmem>>, %arg5: memref<1x32xf32, #tpu.memory_space<vmem>>, %arg6: memref<1x1xf32, #tpu.memory_space<smem>>, %arg7: memref<2x8x32xf32, #tpu.memory_space<vmem>>, %arg8: memref<8x2x32xf32, #tpu.memory_space<vmem>>) attributes {dimension_semantics = [], scalar_prefetch = 0 : i64, scratch_operands = 0 : i64, tpu.core_type = #tpu.core_type<tc>} {
    %c0 = arith.constant 0 : index
    %c0_0 = arith.constant 0 : index
    %c0_1 = arith.constant 0 : index
    %0 = vector.load %arg2[%c0, %c0_0, %c0_1] : memref<2x8x32xf32, #tpu.memory_space<vmem>>, vector<2x8x32xf32>
    %c0_2 = arith.constant 0 : index
    %c0_3 = arith.constant 0 : index
    %c0_4 = arith.constant 0 : index
    %1 = vector.load %arg0[%c0_2, %c0_3, %c0_4] : memref<2x1x1xf32, #tpu.memory_space<vmem>>, vector<2x1x1xf32>
    %cst = arith.constant 1.000000e+00 : f32
    %2 = vector.broadcast %cst : f32 to vector<2x1x1xf32>
    %3 = arith.subf %2, %1 : vector<2x1x1xf32>
    %cst_5 = arith.constant 1.000000e+00 : f32
    %4 = vector.broadcast %cst_5 : f32 to vector<2x1x1xf32>
    %5 = arith.addf %4, %1 : vector<2x1x1xf32>
    %6 = arith.mulf %3, %5 : vector<2x1x1xf32>
    %7 = math.sqrt %6 : vector<2x1x1xf32>
    %c0_6 = arith.constant 0 : index
    %c0_7 = arith.constant 0 : index
    %c0_8 = arith.constant 0 : index
    %8 = vector.load %arg1[%c0_6, %c0_7, %c0_8] : memref<2x8x32xf32, #tpu.memory_space<vmem>>, vector<2x8x32xf32>
    %9 = vector.broadcast %1 : vector<2x1x1xf32> to vector<2x8x32xf32>
    %10 = arith.mulf %9, %0 : vector<2x8x32xf32>
    %11 = arith.addf %8, %10 : vector<2x8x32xf32>
    %c0_9 = arith.constant 0 : index
    %c0_10 = arith.constant 0 : index
    %c0_11 = arith.constant 0 : index
    %12 = vector.load %arg3[%c0_9, %c0_10, %c0_11] : memref<2x8x32xf32, #tpu.memory_space<vmem>>, vector<2x8x32xf32>
    %13 = vector.broadcast %7 : vector<2x1x1xf32> to vector<2x8x32xf32>
    %14 = arith.mulf %13, %12 : vector<2x8x32xf32>
    %15 = arith.addf %11, %14 : vector<2x8x32xf32>
    %16 = vector.broadcast %1 : vector<2x1x1xf32> to vector<2x8x32xf32>
    %17 = arith.addf %15, %16 : vector<2x8x32xf32>
    %18 = vector.shape_cast %17 : vector<2x8x32xf32> to vector<16x32xf32>
    %c0_12 = arith.constant 0 : index
    %c0_13 = arith.constant 0 : index
    %19 = vector.load %arg4[%c0_12, %c0_13] : memref<32x32xf32, #tpu.memory_space<vmem>>, vector<32x32xf32>
    %cst_14 = arith.constant dense<0.000000e+00> : vector<16x32xf32>
    %20 = tpu.matmul %18, %19, %cst_14 {dimension_numbers = #tpu.dot_dimension_numbers<[1], [0], [0], [1], [0, 0, 1, 1], [], []>} : vector<16x32xf32>, vector<32x32xf32>, vector<16x32xf32> -> vector<16x32xf32>
    %c0_15 = arith.constant 0 : index
    %c0_16 = arith.constant 0 : index
    %21 = vector.load %arg5[%c0_15, %c0_16] : memref<1x32xf32, #tpu.memory_space<vmem>>, vector<1x32xf32>
    %22 = vector.broadcast %21 : vector<1x32xf32> to vector<16x32xf32>
    %23 = arith.addf %20, %22 : vector<16x32xf32>
    %24 = math.tanh %23 : vector<16x32xf32>
    %25 = vector.shape_cast %24 : vector<16x32xf32> to vector<2x8x32xf32>
    %c0_17 = arith.constant 0 : index
    %c0_18 = arith.constant 0 : index
    %c0_19 = arith.constant 0 : index
    %26 = vector.load %arg7[%c0_17, %c0_18, %c0_19] : memref<2x8x32xf32, #tpu.memory_space<vmem>>, vector<2x8x32xf32>
    tpu.vector_store %arg7[%c0_17, %c0_18, %c0_19], %25 {strides = array<i32>} : memref<2x8x32xf32, #tpu.memory_space<vmem>>, vector<2x8x32xf32>,
    %27 = vector.shape_cast %0 : vector<2x8x32xf32> to vector<16x32xf32>
    %28 = arith.subf %27, %24 : vector<16x32xf32>
    %29 = math.absf %28 : vector<16x32xf32>
    %30 = vector.shape_cast %29 : vector<16x32xf32> to vector<1x16x32xf32>
    %cst_20 = arith.constant dense<0.000000e+00> : vector<1xf32>
    %31 = vector.multi_reduction <add>, %30, %cst_20 [1, 2] : vector<1x16x32xf32> to vector<1xf32>
    %32 = vector.shape_cast %31 : vector<1xf32> to vector<1x1x1xf32>
    %33 = vector.extract %32[0, 0, 0] : f32 from vector<1x1x1xf32>
    %c0_21 = arith.constant 0 : index
    %c0_22 = arith.constant 0 : index
    %34 = memref.load %arg6[%c0_21, %c0_22] : memref<1x1xf32, #tpu.memory_space<smem>>
    memref.store %33, %arg6[%c0_21, %c0_22] : memref<1x1xf32, #tpu.memory_space<smem>>
    %cst_23 = arith.constant dense<0xFF800000> : vector<16xf32>
    %35 = vector.multi_reduction <maximumf>, %24, %cst_23 [1] : vector<16x32xf32> to vector<16xf32>
    %36 = vector.shape_cast %35 : vector<16xf32> to vector<16x1xf32>
    %37 = vector.broadcast %36 : vector<16x1xf32> to vector<16x32xf32>
    %38 = arith.subf %24, %37 : vector<16x32xf32>
    %39 = math.exp %38 : vector<16x32xf32>
    %cst_24 = arith.constant dense<0.000000e+00> : vector<16xf32>
    %40 = vector.multi_reduction <add>, %39, %cst_24 [1] : vector<16x32xf32> to vector<16xf32>
    %41 = vector.shape_cast %40 : vector<16xf32> to vector<16x1xf32>
    %42 = math.log %41 : vector<16x1xf32>
    %43 = arith.addf %42, %36 : vector<16x1xf32>
    %44 = vector.broadcast %43 : vector<16x1xf32> to vector<16x32xf32>
    %45 = arith.subf %24, %44 : vector<16x32xf32>
    %46 = vector.shape_cast %45 : vector<16x32xf32> to vector<2x8x32xf32>
    %47 = vector.extract_strided_slice %46 {offsets = [0, 0, 0], sizes = [1, 8, 32], strides = [1, 1, 1]} : vector<2x8x32xf32> to vector<1x8x32xf32>
    %48 = vector.shape_cast %47 : vector<1x8x32xf32> to vector<8x32xf32>
    %c0_25 = arith.constant 0 : index
    %c0_26 = arith.constant 0 : index
    %c0_27 = arith.constant 0 : index
    %49 = vector.load %arg8[%c0_25, %c0_26, %c0_27] : memref<8x2x32xf32, #tpu.memory_space<vmem>>, vector<8x1x32xf32>
    %50 = vector.shape_cast %49 : vector<8x1x32xf32> to vector<8x32xf32>
    %51 = vector.shape_cast %48 : vector<8x32xf32> to vector<8x1x32xf32>
    tpu.vector_store %arg8[%c0_25, %c0_26, %c0_27], %51 {strides = array<i32>} : memref<8x2x32xf32, #tpu.memory_space<vmem>>, vector<8x1x32xf32>,
    %52 = vector.extract_strided_slice %46 {offsets = [1, 0, 0], sizes = [1, 8, 32], strides = [1, 1, 1]} : vector<2x8x32xf32> to vector<1x8x32xf32>
    %53 = vector.shape_cast %52 : vector<1x8x32xf32> to vector<8x32xf32>
    %c0_28 = arith.constant 0 : index
    %c1 = arith.constant 1 : index
    %c0_29 = arith.constant 0 : index
    %54 = vector.load %arg8[%c0_28, %c1, %c0_29] : memref<8x2x32xf32, #tpu.memory_space<vmem>>, vector<8x1x32xf32>
    %55 = vector.shape_cast %54 : vector<8x1x32xf32> to vector<8x32xf32>
    %56 = vector.shape_cast %53 : vector<8x32xf32> to vector<8x1x32xf32>
    tpu.vector_store %arg8[%c0_28, %c1, %c0_29], %56 {strides = array<i32>} : memref<8x2x32xf32, #tpu.memory_space<vmem>>, vector<8x1x32xf32>,
    return
  }
}

</mosaic_0001>

<bundles_post_ra>
// kernel: _p_losses_impl.3
= control target key start
LH: loop header
LB: loop body
LE: loop exit
PB: predicated region body
PF: predicated region fallthrough
CT: control target
= control target key end

     0   :  { %14 = vsyncpa [#allocation4], 0  ;;  %s712_s0 = inlined_call_operand.vmem [shape: f32[2,1,1], index: 0, kind: input, shape index: {}]   ;;  %s713_s1 = inlined_call_operand.vmem [shape: f32[2,8,32], index: 1, kind: input, shape index: {}]   ;;  %s714_s2 = inlined_call_operand.vmem [shape: f32[2,8,32], index: 2, kind: input, shape index: {}]   ;;  %s715_s3 = inlined_call_operand.vmem [shape: f32[2,8,32], index: 3, kind: input, shape index: {}]   ;;  %s716_s4 = inlined_call_operand.vmem [shape: f32[32,32], index: 4, kind: input, shape index: {}]   ;;  %s717_s5 = inlined_call_operand.vmem [shape: f32[1,32], index: 5, kind: input, shape index: {}]   ;;  %s718_s6 = inlined_call_operand.hbm [shape: f32[1,1], index: 6, kind: output, shape index: {0}]   ;;  %s719_s7 = inlined_call_operand.hbm [shape: f32[2,8,32], index: 7, kind: output, shape index: {1}]   ;;  %s720_s8 = inlined_call_operand.hbm [shape: f32[8,2,32], index: 8, kind: output, shape index: {2}]  }
   0x1   :  { %15 = vsyncpa [#allocation3], 0  ;;  %v31_v0 = vld [vmem:[%s712_s0] sm:$0x1]  ;;  %v57_v1 = vlaneseq  ;;  %v539_v2 = vmov 0  }
   0x2   :  { %461 = vset.pattern.permute.xlu0 %v539_v2  ;;  %v33_v3 = vsub.f32 1.0, %v31_v0  ;;  %v35_v4 = vadd.f32 1.0, %v31_v0  ;;  %v32_v5 = vld [vmem:[%s712_s0 + $0x1] sm:$0x1]  ;;  %462 = vset.pattern.permute.xlu1 %v539_v2 }
   0x3   :  { %16 = vsyncpa [#allocation7], 0  ;;  %v599_v6 = vshrl.u32 %v57_v1, 7  ;;  %v34_v7 = vsub.f32 1.0, %v32_v5  ;;  %v36_v8 = vadd.f32 1.0, %v32_v5  ;;  %v103_v25 = vld [vmem:[%s716_s4] sm:$0xff] }
   0x4   :  { %v37_v9 = vmul.f32 %v35_v4, %v33_v3  ;;  %v104_v26 = vld [vmem:[%s716_s4 + $0x8] sm:$0xff]  ;;  %v105_v29 = vld [vmem:[%s716_s4 + $0x10] sm:$0xff]  ;;  %v106_v30 = vld [vmem:[%s716_s4 + $0x18] sm:$0xff]  ;;  %vm114_vm4 = vcmask 261120  }
   0x5   :  { %v59_v10 = vsub.s32 0, %v599_v6  ;;  %v38_v11 = vmul.f32 %v36_v8, %v34_v7  ;;  %v442_v28 = vpack.c.bf16 %v104_v26, %v103_v25  ;;  %v446_v31 = vpack.c.bf16 %v106_v30, %v105_v29  ;;  %v29_v33 = vld [vmem:[%s714_s2] sm:$0xff]  ;;  %v30_v37 = vld [vmem:[%s714_s2 + $0x8] sm:$0xff] }
   0x6   :  { %463 = vrsqrt.f32 %v37_v9  ;;  %vm41_vm0 = vcmp.eq.f32.partialorder %v37_v9, inf  ;;  %v44_v15 = vand.u32 2147483648, %v37_v9  ;;  %vm43_vm1 = vcmp.eq.f32.partialorder %v37_v9, 0.0  ;;  %v53_v35 = vld [vmem:[%s713_s1] sm:$0xff]  ;;  %v54_v43 = vld [vmem:[%s713_s1 + $0x8] sm:$0xff]  ;;  %s540_s1 = smov [#allocation5]  }
   0x7   :  { %v60_v12 = vrot.slane %v31_v0, %v59_v10  ;;  %465 = vrsqrt.f32 %v38_v11  ;;  %v64_v13 = vrot.slane %v32_v5, %v59_v10  ;;  %vm48_vm2 = vcmp.eq.f32.partialorder %v38_v11, inf  ;;  %443 = vmatprep.subr.bf16.mxu0 %v442_v28  ;;  %v77_v38 = vld [vmem:[%s715_s3] sm:$0xff]  ;;  %v78_v44 = vld [vmem:[%s715_s3 + $0x8] sm:$0xff]  ;;  %s390_s3 = sshll.u32 %s540_s1, 4  ;;  %s391_s3 = int_to_ptr.vmem [resolvable:$true] %s390_s3 }
   0x8   :  { %v51_v18 = vand.u32 2147483648, %v38_v11  ;;  %vm50_vm3 = vcmp.eq.f32.partialorder %v38_v11, 0.0  ;;  %445 = vmatpush3.bf16.msra.mxu0 %v442_v28  ;;  %v422_v52 = vld [vmem:[%s717_s5] ss:$0 sm:$0xff]  ;;  %s479_s5 = scalar_lea.vmem %s391_s3, 256  ;;  %p484_p1 = scmp.lt.s32.totalorder %s391_s3, %s391_s3 }
   0x9   :  { %66 = vperm.xlu0 %461, %v60_v12   ;;  %447 = vmatprep.subr.bf16.mxu0 %v446_v31  ;;  %p480_p0 = scmp.ne.s32.totalorder %s391_s3, %s479_s5  ;;  %p485_p2 = scmp.lt.s32.totalorder %s479_s5, %s479_s5 }
   0xb   :  { %p486_p3 = por %p485_p2, %p484_p1 }
   0xc   :  { %449 = vmatpush3.bf16.msra.mxu0 %v446_v31 }
   0xd   :  { %70 = vperm.xlu0 %461, %v64_v13   ;;  %p487_p4 = pnand %p486_p3, %p480_p0 }
  0x10   :  { %v464_v14 = vpop.eup %463 }
  0x11   :  { %v466_v16 = vpop.eup %465  ;;  %v40_v17 = vmul.f32 %v464_v14, %v37_v9 }
  0x12   :  { %v47_v19 = vmul.f32 %v466_v16, %v38_v11 }
  0x13   :  { %v42_v20 = vsel %vm41_vm0, %v37_v9, %v40_v17 }
  0x14   :  { %v45_v21 = vsel %vm43_vm1, %v44_v15, %v42_v20  ;;  %v49_v22 = vsel %vm48_vm2, %v38_v11, %v47_v19 }
  0x15   :  { %v84_v23 = vrot.slane %v45_v21, %v59_v10  ;;  %v52_v24 = vsel %vm50_vm3, %v51_v18, %v49_v22 }
  0x16   :  { %v88_v27 = vrot.slane %v52_v24, %v59_v10 }
  0x17   :  { %90 = vperm.xlu1 %462, %v84_v23  }
  0x1b   :  { %94 = vperm.xlu1 %462, %v88_v27  }
  0x88   :  { %v67_v32 = vpop.permute.xlu0 %66 }
  0x89   :  { %v73_v34 = vmul.f32 %v67_v32, %v29_v33 }
  0x8b   :  { %v75_v39 = vadd.f32 %v73_v34, %v53_v35 }
  0x8c   :  { %v71_v36 = vpop.permute.xlu0 %70 }
  0x8d   :  { %v74_v41 = vmul.f32 %v71_v36, %v30_v37 }
  0x8f   :  { %v76_v47 = vadd.f32 %v74_v41, %v54_v43 }
  0x96   :  { %v91_v40 = vpop.permute.xlu1 %90 }
  0x97   :  { %v97_v42 = vmul.f32 %v91_v40, %v77_v38 }
  0x99   :  { %v99_v45 = vadd.f32 %v97_v42, %v75_v39 }
  0x9a   :  { %v95_v46 = vpop.permute.xlu1 %94 }
  0x9b   :  { %v98_v48 = vmul.f32 %v95_v46, %v78_v44  ;;  %v101_v49 = vadd.f32 %v99_v45, %v67_v32 }
  0x9d   :  { %v100_v50 = vadd.f32 %v98_v48, %v76_v47  ;;  %439 = vmatprep.mubr.msk.f32.mxu0 %vm114_vm4, %v101_v49 }
  0x9f   :  { %v102_v51 = vadd.f32 %v100_v50, %v71_v36 }
  0xa1   :  { %440 = vmatmul.mubr.msk.f32.vlgmr.msra.gmra.mrb[0].mxu0 %vm114_vm4, %v102_v51 }
 0x174   :  { %v441_v53 = vpop.f32.mrb[0].mxu0 }
 0x175   :  { %v193_v54 = vadd.f32 %v441_v53, %v422_v52  ;;  %v187_v55 = vpop.f32.mrb[1].mxu0 }
 0x176   :  { %v188_v56 = vadd.f32 %v422_v52, %v187_v55 }
 0x177   :  { %467 = vtanh.f32 %v193_v54 }
 0x178   :  { %469 = vtanh.f32 %v188_v56 }
 0x181   :  { %v637_v57 = vpop.eup %467 }
 0x182   :  { %v639_v58 = vpop.eup %469  ;;  %199 = vst.msk [vmem:[#allocation5 + $0x8] sm:$0xff] %vm114_vm4, %v637_v57  ;;  %v221_v59 = vsel %vm114_vm4, %v637_v57, -inf  ;;  %v201_v60 = vsub.f32 %v30_v37, %v637_v57 }
 0x183   :  { %198 = vst.msk [vmem:[#allocation5] sm:$0xff] %vm114_vm4, %v639_v58  ;;  %222 = vmax.xlane.f32.xlu1 %v221_v59  ;;  %v218_v61 = vsel %vm114_vm4, %v639_v58, -inf  ;;  %v200_v62 = vsub.f32 %v29_v33, %v639_v58 }
 0x184   :  { %219 = vmax.xlane.f32.xlu0 %v218_v61  ;;  %v203_v63 = vand.u32 2147483647, %v201_v60 }
 0x185   :  { %v202_v0 = vand.u32 2147483647, %v200_v62 }
 0x186   :  { %v205_v1 = vsel %vm114_vm4, %v203_v63, 0.0 }
 0x187   :  { %v204_v2 = vsel %vm114_vm4, %v202_v0, 0.0 }
 0x188   :  { %v206_v3 = vadd.f32 %v205_v1, %v204_v2 }
 0x18a   :  { %207 = vadd.xlane.f32.xlu0 %v206_v3 }
 0x210   :  { %v223_v4 = vpop.xlane.xlu1 %222 }
 0x211   :  { %v225_v5 = vsub.f32 %v637_v57, %v223_v4  ;;  %v220_v7 = vpop.xlane.xlu0 %219 }
 0x212   :  { %v224_v8 = vsub.f32 %v639_v58, %v220_v7 }
 0x213   :  { %v228_v9 = vmul.f32 1.442695, %v225_v5 }
 0x214   :  { %v226_v10 = vmul.f32 1.442695, %v224_v8 }
 0x215   :  { %471 = vpow2.f32 %v228_v9 }
 0x216   :  { %473 = vpow2.f32 %v226_v10 }
 0x217   :  { %v208_v11 = vpop.xlane.xlu0 %207 }
 0x218   :  { %v209_v12 = vrot.slane %v208_v11, 4 }
 0x21a   :  { %v210_v13 = vadd.f32 %v209_v12, %v208_v11 }
 0x21c   :  { %v211_v14 = vrot.slane %v210_v13, 2 }
 0x21e   :  { %v212_v15 = vadd.f32 %v211_v14, %v210_v13 }
 0x21f   :  { %v472_v16 = vpop.eup %471 }
 0x220   :  { %v474_v17 = vpop.eup %473  ;;  %v233_v18 = vsel %vm114_vm4, %v472_v16, 0.0  ;;  %v213_v19 = vrot.slane %v212_v15, 1 }
 0x221   :  { %234 = vadd.xlane.f32.xlu1 %v233_v18  ;;  %v230_v20 = vsel %vm114_vm4, %v474_v17, 0.0 }
 0x222   :  { %231 = vadd.xlane.f32.xlu0 %v230_v20  ;;  %v214_v21 = vadd.f32 %v213_v19, %v212_v15 }
 0x224   :  { %450 = vpush %v214_v21 }
 0x225   :  { %490 = shalt.err (!%p487_p4)
}
 0x226   :  { %s491_s30 = scalar_lea.hbm %s719_s7, 256 }
 0x227   :  { %p492_p5 = scmp.ne.s32.totalorder %s719_s7, %s491_s30  ;;  %p495_p6 = scmp.lt.u32.totalorder %s491_s30, %s719_s7 }
 0x229   :  { %p497_p7 = pnand %p495_p6, %p492_p5 }
 0x22b   :  { %500 = shalt.err (!%p497_p7)
}
 0x22c   :  { %s541_s12 = smov 128   ;;  %s542_s13 = smov 8  }
 0x22d   :  { %396 = dma.vmem_to_hbm [thread:$0]  %s391_s3, 256, %s719_s7, [#allocation3], %s541_s12, %s541_s12, %s542_s13  }
 0x22e   :  { %s501_s19 = scalar_lea.hbm %s718_s6, 16 }
 0x22f   :  { %p502_p8 = scmp.ne.s32.totalorder %s718_s6, %s501_s19  ;;  %p505_p9 = scmp.lt.u32.totalorder %s501_s19, %s718_s6 }
 0x231   :  { %p507_p10 = pnand %p505_p9, %p502_p8 }
 0x255   :  { %s451_s16 = spop %450 }
 0x256   :  { %217 = sst [smem:[#allocation2]] %s451_s16 }
 0x257   :  { %510 = shalt.err (!%p507_p10)
}
 0x258   :  { %s543_s23 = smov [#allocation2]   ;;  %v544_v24 = vmov 1966171168   ;;  %vm302_vm5 = vcmask 253952  }
 0x259   :  { %384 = dma.smem_to_hbm %s543_s23, 16, %s718_s6, [#allocation4]   ;;  %v247_v25 = vunpack.c.l.s4 %v544_v24 }
 0x25a   :  { %s545_s6 = smov [#allocation6]  }
 0x25b   :  { %v248_v26 = vunpack.c.0.s8 %v247_v25  ;;  %s402_s7 = sshll.u32 %s545_s6, 4  ;;  %s403_s7 = int_to_ptr.vmem [resolvable:$true] %s402_s7 }
 0x25c   :  { %s511_s26 = scalar_lea.vmem %s403_s7, 256  ;;  %p516_p12 = scmp.lt.s32.totalorder %s403_s7, %s403_s7 }
 0x25d   :  { %v251_v31 = vsub.s32 %v248_v26, %v599_v6  ;;  %p512_p11 = scmp.ne.s32.totalorder %s403_s7, %s511_s26  ;;  %p517_p13 = scmp.lt.s32.totalorder %s511_s26, %s511_s26 }
 0x25f   :  { %p518_p0 = por %p517_p13, %p516_p12 }
 0x261   :  { %p519_p1 = pnand %p518_p0, %p512_p11 }
 0x2ae   :  { %v235_v22 = vpop.xlane.xlu1 %234 }
 0x2af   :  { %475 = vlog2.f32 %v235_v22  ;;  %v232_v23 = vpop.xlane.xlu0 %231 }
 0x2b0   :  { %477 = vlog2.f32 %v232_v23 }
 0x2b9   :  { %v476_v27 = vpop.eup %475 }
 0x2ba   :  { %v478_v28 = vpop.eup %477  ;;  %v239_v29 = vmul.f32 0.6931472, %v476_v27 }
 0x2bb   :  { %v237_v30 = vmul.f32 0.6931472, %v478_v28 }
 0x2bc   :  { %v241_v32 = vadd.f32 %v239_v29, %v223_v4 }
 0x2bd   :  { %v240_v33 = vadd.f32 %v237_v30, %v220_v7 }
 0x2be   :  { %v243_v34 = vsub.f32 %v637_v57, %v241_v32 }
 0x2bf   :  { %v242_v35 = vsub.f32 %v639_v58, %v240_v33 }
 0x2c0   :  { %v312_v36 = vcombine.high %v243_v34, %v243_v34  ;;  %v319_v37 = vrot.slane %v243_v34, %v251_v31 }
 0x2c1   :  { %v245_v38 = vcombine.high %v242_v35, %v242_v35  ;;  %v252_v39 = vrot.slane %v242_v35, %v251_v31 }
 0x2c2   :  { %v326_v40 = vrot.slane %v312_v36, %v251_v31  ;;  %v327_v41 = vcombine.high %v319_v37, %v319_v37  ;;  %v335_v42 = vrot.slane %v319_v37, %v251_v31 }
 0x2c3   :  { %v259_v43 = vrot.slane %v245_v38, %v251_v31  ;;  %v260_v44 = vcombine.high %v252_v39, %v252_v39  ;;  %v268_v45 = vrot.slane %v252_v39, %v251_v31 }
 0x2c4   :  { %v328_v46 = vcombine.high %v326_v40, %v326_v40  ;;  %v342_v47 = vrot.slane %v326_v40, %v251_v31  ;;  %v349_v6 = vrot.slane %v327_v41, %v251_v31  ;;  %v357_v48 = vcombine.high %v335_v42, %v335_v42  ;;  %369 = vst.msk [vmem:[#allocation6 + $0x1] sm:$0x1] %vm302_vm5, %v335_v42 }
 0x2c5   :  { %v261_v49 = vcombine.high %v259_v43, %v259_v43  ;;  %v275_v50 = vrot.slane %v259_v43, %v251_v31  ;;  %v282_v51 = vrot.slane %v260_v44, %v251_v31  ;;  %v290_v52 = vcombine.high %v268_v45, %v268_v45  ;;  %303 = vst.msk [vmem:[#allocation6] sm:$0x1] %vm302_vm5, %v268_v45 }
 0x2c6   :  { %v356_v53 = vrot.slane %v328_v46, %v251_v31  ;;  %v358_v54 = vcombine.high %v342_v47, %v342_v47  ;;  %v359_v55 = vcombine.high %v349_v6, %v349_v6  ;;  %370 = vst.msk [vmem:[#allocation6 + $0x3] sm:$0x1] %vm302_vm5, %v349_v6  ;;  %371 = vst.msk [vmem:[#allocation6 + $0x5] sm:$0x1] %vm302_vm5, %v357_v48 }
 0x2c7   :  { %373 = vst.msk [vmem:[#allocation6 + $0x9] sm:$0x1] %vm302_vm5, %v342_v47  ;;  %v289_v56 = vrot.slane %v261_v49, %v251_v31  ;;  %v291_v57 = vcombine.high %v275_v50, %v275_v50  ;;  %v292_v58 = vcombine.high %v282_v51, %v282_v51  ;;  %304 = vst.msk [vmem:[#allocation6 + $0x2] sm:$0x1] %vm302_vm5, %v282_v51 }
 0x2c8   :  { %305 = vst.msk [vmem:[#allocation6 + $0x4] sm:$0x1] %vm302_vm5, %v290_v52  ;;  %307 = vst.msk [vmem:[#allocation6 + $0x8] sm:$0x1] %vm302_vm5, %v275_v50  ;;  %v360_v59 = vcombine.high %v356_v53, %v356_v53 }
 0x2c9   :  { %372 = vst.msk [vmem:[#allocation6 + $0x7] sm:$0x1] %vm302_vm5, %v359_v55  ;;  %374 = vst.msk [vmem:[#allocation6 + $0xb] sm:$0x1] %vm302_vm5, %v356_v53  ;;  %v293_v60 = vcombine.high %v289_v56, %v289_v56 }
 0x2ca   :  { %375 = vst.msk [vmem:[#allocation6 + $0xd] sm:$0x1] %vm302_vm5, %v358_v54  ;;  %306 = vst.msk [vmem:[#allocation6 + $0x6] sm:$0x1] %vm302_vm5, %v292_v58 }
 0x2cb   :  { %308 = vst.msk [vmem:[#allocation6 + $0xa] sm:$0x1] %vm302_vm5, %v289_v56  ;;  %309 = vst.msk [vmem:[#allocation6 + $0xc] sm:$0x1] %vm302_vm5, %v291_v57 }
 0x2cc   :  { %376 = vst.msk [vmem:[#allocation6 + $0xf] sm:$0x1] %vm302_vm5, %v360_v59  ;;  %310 = vst.msk [vmem:[#allocation6 + $0xe] sm:$0x1] %vm302_vm5, %v293_v60 }
 0x2cd   :  { %522 = shalt.err (!%p519_p1)
}
 0x2ce   :  { %s523_s1 = scalar_lea.hbm %s720_s8, 256 }
 0x2cf   :  { %p524_p2 = scmp.ne.s32.totalorder %s720_s8, %s523_s1  ;;  %p527_p3 = scmp.lt.u32.totalorder %s523_s1, %s720_s8 }
 0x2d1   :  { %p529_p4 = pnand %p527_p3, %p524_p2 }
 0x2d3   :  { %532 = shalt.err (!%p529_p4)
}
 0x2d4   :  { %s546_s30 = smov 32   ;;  %s547_s0 = smov 2  }
 0x2d5   :  { %408 = dma.vmem_to_hbm [thread:$0]  %s403_s7, 256, %s720_s8, [#allocation7], %s546_s30, %s546_s30, %s547_s0  }
 0x2d6   :  { %533 = dma.done.wait [#allocation4], 16  }
 0x2d7   :  { %534 = vsyncadd [#allocation4], 4294967280 }
 0x2d8   :  { %535 = dma.done.wait [#allocation3], 256  }
 0x2d9   :  { %536 = vsyncadd [#allocation3], 4294967040 }
 0x2da   :  { %537 = dma.done.wait [#allocation7], 256  }
 0x2db   :  { %538 = vsyncadd [#allocation7], 4294967040 }
 0x2dc   :  { %418 = sfence }
 0x2dd   :  { %419 = vsyncpa [#allocation3], 1 }
 0x2de   :  { %420 = vsyncpa [#allocation7], 1 }
 0x2df   :  { %421 = vsyncpa [#allocation4], 1 }

</bundles_post_ra>
